<compile_context>
chip_gen: v6e
topology: v6e:2x2x1
jax: 0.10.0
libtpu: 0.0.40
codegen_flags: <defaults>
</compile_context>

<pallas_src>
import functools

import jax
import jax.numpy as jnp
import numpy as np
from jax.experimental import pallas as pl
from jax.experimental.pallas import tpu as pltpu

_LANE = 128


def _round_up(x, m):
    return ((x + m - 1) // m) * m


def _vmem_capacity_bytes():
    """Physical VMEM of the local TPU generation (128 MiB v5e/v6e, 64 MiB v7x)."""
    try:
        info = pltpu.get_tpu_info()
        for attr in ("vmem_capacity_bytes", "vmem_size_bytes"):
            cap = getattr(info, attr, None)
            if cap:
                return int(cap)
    except Exception:
        pass
    return 64 << 20  # conservative fallback (v7x per-TensorCore VMEM)


def _pick_batch_tile(B, target):
    """Batch tile: multiple of 8 (or == B), divides B, and — for B >= 16 —
    guarantees >= 2 grid steps so the "parallel" batch axis can shard across
    v7x's two TensorCores (tb == B would serialize everything on one TC)."""
    if B >= 16:
        divs = [d for d in range(8, B // 2 + 1, 8) if B % d == 0]
        if divs:
            capped = [d for d in divs if d <= max(target, 8)]
            return max(capped) if capped else min(divs)
    return B


def _pick_seq_tile(S, ts_cap, align):
    """Largest packing-aligned seq tile that divides S and fits the VMEM budget."""
    ts_cap = max(min(ts_cap, S), 1)
    if S <= ts_cap:
        return S                                   # whole sequence in one block
    start = (ts_cap // align) * align
    for ts in range(start, align - 1, -align):     # aligned divisors, largest first
        if S % ts == 0:
            return ts
    start8 = (ts_cap // 8) * 8
    for ts in range(start8, 7, -8):                # any multiple-of-8 divisor
        if S % ts == 0:
            return ts
    # TODO(synk): pathological S with no multiple-of-8 divisor under the budget;
    # fall back to the whole sequence (block == full dim is always legal) rather
    # than masked ragged-tail handling.
    return S


def _avg_head_kernel(hs_ref, w_ref, b_ref, logits_ref, hidden_ref, *scratch,
                     inv_s, seq_sub):
    """Grid = (batch_tiles, seq_tiles); seq is the trailing reduction axis.

    hs_ref     : [tb, ts, H]   tile of encoder last_hidden_state (streamed)
    w_ref      : [H, Cpad]     classifier weight in the activation dtype (resident)
    b_ref      : [1, Cpad] f32 classifier bias, lane-padded (resident)
    logits_ref : [tb, Cpad]    logits output block (resident across seq axis)
    hidden_ref : [tb, H]       mean-pooled hidden output block (resident across seq axis)
    scratch    : ([tb, H] f32 accumulator,) for non-f32 inputs; empty for f32
                 inputs (accumulate directly into hidden_ref).
    """
    acc_ref = scratch[0] if scratch else hidden_ref
    k = pl.program_id(1)

    @pl.when(k == 0)
    def _init():
        acc_ref[...] = jnp.zeros_like(acc_ref)
        # classifier(last_hidden_state[:, 0]): seq position 0 lives in the
        # k == 0 tile, so the tiny matmul + bias add run exactly once per batch
        # tile (free filler under the DMA-bound streaming loop).  Keep the CLS
        # row in the input dtype -> native MXU bf16 path, f32 accumulation.
        cls_tok = hs_ref[:, 0, :]
        logits = jnp.dot(cls_tok, w_ref[...], preferred_element_type=jnp.float32)
        logits_ref[...] = (logits + b_ref[...]).astype(logits_ref.dtype)

    # Fused streaming reduction: sum over seq in f32 without materializing a
    # full f32 copy of the tile — the upcast temporary is only [tb, seq_sub, H].
    tb, ts, h = hs_ref.shape
    total = jnp.zeros((tb, h), jnp.float32)
    for j in range(ts // seq_sub):                 # short, statically unrolled
        chunk = hs_ref[:, pl.ds(j * seq_sub, seq_sub), :]
        total = total + jnp.sum(chunk, axis=1, dtype=jnp.float32)
    acc_ref[...] += total

    @pl.when(k == pl.num_programs(1) - 1)
    def _finalize():
        # Single scale by 1/S at finalize (instead of a per-tile mean divide).
        hidden_ref[...] = (acc_ref[...] * inv_s).astype(hidden_ref.dtype)


def _cls_head_kernel(cls_ref, w_ref, b_ref, logits_ref, hidden_ref):
    """Grid = (batch_tiles,). Consumes only the pre-sliced CLS slab [tb, H]."""
    cls_tok = cls_ref[...]
    hidden_ref[...] = cls_tok.astype(hidden_ref.dtype)
    logits = jnp.dot(cls_tok, w_ref[...], preferred_element_type=jnp.float32)
    logits_ref[...] = (logits + b_ref[...]).astype(logits_ref.dtype)


def classification_head(hidden_states, weight, bias, *, prototype="average",
                        batch_tile=8, seq_tile=None):
    """Pooling + classifier head. Returns (logits [B,C] f32, hidden [B,H])."""
    B, S, H = hidden_states.shape
    Hw, C = weight.shape
    assert Hw == H, (Hw, H)

    in_dtype = hidden_states.dtype
    elt = jnp.dtype(in_dtype).itemsize
    align = max(8, 32 // elt)                       # packed sublane tile: 8/16/32

    # Lane-dense classifier output: pad n_class up to a multiple of 128 so the
    # logits store is an unmasked full-lane vst; sliced back outside the kernel.
    Cpad = _round_up(C, _LANE)
    # Keep the weight in the activation dtype (native MXU bf16 path, half the
    # resident VMEM / HBM bytes); bias stays f32 and is added post-matmul.
    w_p = jnp.pad(weight.astype(in_dtype), ((0, 0), (0, Cpad - C)))
    b_p = jnp.pad(bias.astype(jnp.float32), (0, Cpad - C)).reshape(1, Cpad)

    tb = _pick_batch_tile(B, batch_tile)
    vmem_cap = _vmem_capacity_bytes()

    acc_in_output = jnp.dtype(in_dtype) == jnp.dtype(jnp.float32)
    # Bytes resident across the whole grid (double-buffered params & output
    # blocks + f32 accumulator scratch).
    # TODO(synk): pipeline_mode=pl.Buffered(1) on the grid-invariant weight/bias
    # specs would single-buffer them; left at the default for compatibility.
    resident = (2 * (H * Cpad * elt + Cpad * 4)
                + 2 * (tb * Cpad * 4 + tb * H * elt)
                + (0 if acc_in_output else tb * H * 4))

    if prototype == "average":
        # Seq tile from the per-generation VMEM budget (double-buffered input
        # tile kept under ~65% of physical VMEM, leaving compiler headroom).
        hs_budget = max(int(0.65 * vmem_cap) - resident, 2 * align * tb * H * elt)
        ts_cap = hs_budget // max(1, 2 * tb * H * elt)
        if seq_tile is not None:
            ts_cap = min(ts_cap, seq_tile)
        ts = _pick_seq_tile(S, ts_cap, align)
        seq_sub = ts
        for cand in (64, 32, 16, 8):
            if ts % cand == 0:
                seq_sub = cand
                break

        grid = (B // tb, S // ts)
        vmem_bytes = 2 * tb * ts * H * elt + resident + tb * seq_sub * H * 4
        kernel = functools.partial(_avg_head_kernel, inv_s=1.0 / float(S),
                                   seq_sub=seq_sub)
        scratch_shapes = [] if acc_in_output else [pltpu.VMEM((tb, H), jnp.float32)]
        grid_spec = pltpu.PrefetchScalarGridSpec(
            num_scalar_prefetch=0,
            grid=grid,
            in_specs=[
                pl.BlockSpec((tb, ts, H), lambda i, k: (i, k, 0)),
                pl.BlockSpec((H, Cpad), lambda i, k: (0, 0)),
                pl.BlockSpec((1, Cpad), lambda i, k: (0, 0)),
            ],
            out_specs=[
                pl.BlockSpec((tb, Cpad), lambda i, k: (i, 0)),
                pl.BlockSpec((tb, H), lambda i, k: (i, 0)),
            ],
            scratch_shapes=scratch_shapes,
        )
        dim_sem = ("parallel", "arbitrary")
        inputs = (hidden_states, w_p, b_p)
    elif prototype == "cls":
        # Only seq position 0 is needed: slice it out so the kernel DMAs B*H
        # instead of B*S*H (S-fold less HBM traffic).
        # TODO(synk): a seq-squeezed BlockSpec on hidden_states would drop this
        # tiny XLA slice, but a 1-row sublane block is not (8,128)-friendly.
        cls_slab = hidden_states[:, 0, :]                      # [B, H]
        grid = (B // tb,)
        vmem_bytes = 2 * tb * H * elt + resident
        kernel = _cls_head_kernel
        grid_spec = pltpu.PrefetchScalarGridSpec(
            num_scalar_prefetch=0,
            grid=grid,
            in_specs=[
                pl.BlockSpec((tb, H), lambda i: (i, 0)),
                pl.BlockSpec((H, Cpad), lambda i: (0, 0)),
                pl.BlockSpec((1, Cpad), lambda i: (0, 0)),
            ],
            out_specs=[
                pl.BlockSpec((tb, Cpad), lambda i: (i, 0)),
                pl.BlockSpec((tb, H), lambda i: (i, 0)),
            ],
        )
        dim_sem = ("parallel",)
        inputs = (cls_slab, w_p, b_p)
    else:
        raise NotImplementedError(prototype)

    # Scoped VMEM limit: accurate (already double-buffered) estimate + headroom
    # for compiler-internal scratch, capped at the generation's physical VMEM.
    vmem_limit = int(min(max(vmem_bytes + (8 << 20), 32 << 20), vmem_cap))

    logits_pad, hidden = pl.pallas_call(
        kernel,
        grid_spec=grid_spec,
        out_shape=(
            jax.ShapeDtypeStruct((B, Cpad), jnp.float32),
            jax.ShapeDtypeStruct((B, H), in_dtype),
        ),
        compiler_params=pltpu.CompilerParams(
            dimension_semantics=dim_sem,
            vmem_limit_bytes=vmem_limit,
        ),
    )(*inputs)

    return logits_pad[:, :C], hidden


def _reference(hidden_states, weight, bias, prototype):
    hs = hidden_states.astype(jnp.float32)
    cls_tok = hs[:, 0]
    hidden = jnp.mean(hs, axis=1) if prototype == "average" else cls_tok
    logits = cls_tok @ weight.astype(jnp.float32) + bias.astype(jnp.float32)
    return logits, hidden


if __name__ == "__main__":
    key = jax.random.PRNGKey(0)
    ok = True

    # (B, S, H, n_class, dtype, batch_tile, seq_tile)
    configs = [
        (2, 8, 32, 4, jnp.float32, 8, None),     # small shapes from the module's forward
        (16, 64, 128, 4, jnp.bfloat16, 8, 16),   # multi-tile grid on both axes, bf16 packing
        (16, 48, 128, 5, jnp.bfloat16, 8, None), # whole-seq tile, odd n_class (lane padding)
    ]
    for (B, S, H, C, dtype, tb, ts) in configs:
        key, k_hs, k_w, k_b = jax.random.split(key, 4)
        # Synthetic "last_hidden_state" standing in for the pretrained encoder output.
        hidden_states = jax.random.normal(k_hs, (B, S, H), dtype=jnp.float32).astype(dtype)
        weight = jax.random.normal(k_w, (H, C), dtype=jnp.float32) * 0.02
        bias = jax.random.normal(k_b, (C,), dtype=jnp.float32) * 0.01
        tol = 1e-5 if dtype == jnp.float32 else 2e-2

        for prototype in ("average", "cls"):
            logits, hidden = classification_head(
                hidden_states, weight, bias,
                prototype=prototype, batch_tile=tb, seq_tile=ts)
            jax.block_until_ready((logits, hidden))
            ref_logits, ref_hidden = _reference(hidden_states, weight, bias, prototype)
            ok &= np.allclose(np.asarray(logits, dtype=np.float32),
                              np.asarray(ref_logits), atol=tol)
            ok &= np.allclose(np.asarray(hidden, dtype=np.float32),
                              np.asarray(ref_hidden), atol=tol)

    print("KERNEL_OK" if ok else "KERNEL_MISMATCH")
</pallas_src>

<mosaic_0001>
module attributes {stable_mosaic.version = 11 : i64} {
  func.func @_avg_head_kernel(%arg0: i32, %arg1: i32, %arg2: memref<2x8x32xf32, #tpu.memory_space<vmem>>, %arg3: memref<32x128xf32, #tpu.memory_space<vmem>>, %arg4: memref<1x128xf32, #tpu.memory_space<vmem>>, %arg5: memref<2x128xf32, #tpu.memory_space<vmem>>, %arg6: memref<2x32xf32, #tpu.memory_space<vmem>>) attributes {dimension_semantics = [#tpu.dimension_semantics<parallel>, #tpu.dimension_semantics<arbitrary>], iteration_bounds = array<i64: 1, 1>, scalar_prefetch = 0 : i64, scratch_operands = 0 : i64, tpu.core_type = #tpu.core_type<tc>, window_params = [{transform_indices = @transform_0, window_bounds = array<i64: 2, 8, 32>}, {pipeline_mode = #tpu.pipeline_mode<synchronous>, transform_indices = @transform_1, window_bounds = array<i64: 32, 128>}, {pipeline_mode = #tpu.pipeline_mode<synchronous>, transform_indices = @transform_2, window_bounds = array<i64: 1, 128>}, {transform_indices = @transform_3, window_bounds = array<i64: 2, 128>}, {transform_indices = @transform_4, window_bounds = array<i64: 2, 32>}]} {
    %c0_i32 = arith.constant 0 : i32
    %0 = arith.cmpi eq, %arg1, %c0_i32 : i32
    %1 = arith.extui %0 : i1 to i32
    %c0_i32_0 = arith.constant 0 : i32
    %2 = arith.cmpi ne, %1, %c0_i32_0 : i32
    scf.if %2 {
      %cst_10 = arith.constant 0.000000e+00 : f32
      %13 = vector.broadcast %cst_10 : f32 to vector<2x32xf32>
      %c0_11 = arith.constant 0 : index
      %c0_12 = arith.constant 0 : index
      %14 = vector.load %arg6[%c0_11, %c0_12] : memref<2x32xf32, #tpu.memory_space<vmem>>, vector<2x32xf32>
      tpu.vector_store %arg6[%c0_11, %c0_12], %13 {strides = array<i32>} : memref<2x32xf32, #tpu.memory_space<vmem>>, vector<2x32xf32>,
      %c0_13 = arith.constant 0 : index
      %c0_14 = arith.constant 0 : index
      %c0_15 = arith.constant 0 : index
      %15 = vector.load %arg2[%c0_13, %c0_14, %c0_15] : memref<2x8x32xf32, #tpu.memory_space<vmem>>, vector<2x1x32xf32>
      %16 = vector.shape_cast %15 : vector<2x1x32xf32> to vector<2x32xf32>
      %c0_16 = arith.constant 0 : index
      %c0_17 = arith.constant 0 : index
      %17 = vector.load %arg3[%c0_16, %c0_17] : memref<32x128xf32, #tpu.memory_space<vmem>>, vector<32x128xf32>
      %cst_18 = arith.constant dense<0.000000e+00> : vector<2x128xf32>
      %18 = tpu.matmul %16, %17, %cst_18 {dimension_numbers = #tpu.dot_dimension_numbers<[1], [0], [0], [1], [0, 0, 1, 1], [], []>} : vector<2x32xf32>, vector<32x128xf32>, vector<2x128xf32> -> vector<2x128xf32>
      %c0_19 = arith.constant 0 : index
      %c0_20 = arith.constant 0 : index
      %19 = vector.load %arg4[%c0_19, %c0_20] : memref<1x128xf32, #tpu.memory_space<vmem>>, vector<1x128xf32>
      %20 = vector.broadcast %19 : vector<1x128xf32> to vector<2x128xf32>
      %21 = arith.addf %18, %20 : vector<2x128xf32>
      %c0_21 = arith.constant 0 : index
      %c0_22 = arith.constant 0 : index
      %22 = vector.load %arg5[%c0_21, %c0_22] : memref<2x128xf32, #tpu.memory_space<vmem>>, vector<2x128xf32>
      tpu.vector_store %arg5[%c0_21, %c0_22], %21 {strides = array<i32>} : memref<2x128xf32, #tpu.memory_space<vmem>>, vector<2x128xf32>,
    } else {
    }
    %cst = arith.constant 0.000000e+00 : f32
    %3 = vector.broadcast %cst : f32 to vector<2x32xf32>
    %c0 = arith.constant 0 : index
    %c0_1 = arith.constant 0 : index
    %c0_2 = arith.constant 0 : index
    %4 = vector.load %arg2[%c0, %c0_1, %c0_2] : memref<2x8x32xf32, #tpu.memory_space<vmem>>, vector<2x8x32xf32>
    %cst_3 = arith.constant dense<0.000000e+00> : vector<2x32xf32>
    %5 = vector.multi_reduction <add>, %4, %cst_3 [1] : vector<2x8x32xf32> to vector<2x32xf32>
    %6 = arith.addf %3, %5 : vector<2x32xf32>
    %c0_4 = arith.constant 0 : index
    %c0_5 = arith.constant 0 : index
    %7 = vector.load %arg6[%c0_4, %c0_5] : memref<2x32xf32, #tpu.memory_space<vmem>>, vector<2x32xf32>
    %8 = arith.addf %7, %6 : vector<2x32xf32>
    %c0_6 = arith.constant 0 : index
    %c0_7 = arith.constant 0 : index
    %9 = vector.load %arg6[%c0_6, %c0_7] : memref<2x32xf32, #tpu.memory_space<vmem>>, vector<2x32xf32>
    tpu.vector_store %arg6[%c0_6, %c0_7], %8 {strides = array<i32>} : memref<2x32xf32, #tpu.memory_space<vmem>>, vector<2x32xf32>,
    %c0_i32_8 = arith.constant 0 : i32
    %10 = arith.cmpi eq, %arg1, %c0_i32_8 : i32
    %11 = arith.extui %10 : i1 to i32
    %c0_i32_9 = arith.constant 0 : i32
    %12 = arith.cmpi ne, %11, %c0_i32_9 : i32
    scf.if %12 {
      %c0_10 = arith.constant 0 : index
      %c0_11 = arith.constant 0 : index
      %13 = vector.load %arg6[%c0_10, %c0_11] : memref<2x32xf32, #tpu.memory_space<vmem>>, vector<2x32xf32>
      %cst_12 = arith.constant 1.250000e-01 : f32
      %14 = vector.broadcast %cst_12 : f32 to vector<2x32xf32>
      %15 = arith.mulf %13, %14 : vector<2x32xf32>
      %c0_13 = arith.constant 0 : index
      %c0_14 = arith.constant 0 : index
      %16 = vector.load %arg6[%c0_13, %c0_14] : memref<2x32xf32, #tpu.memory_space<vmem>>, vector<2x32xf32>
      tpu.vector_store %arg6[%c0_13, %c0_14], %15 {strides = array<i32>} : memref<2x32xf32, #tpu.memory_space<vmem>>, vector<2x32xf32>,
    } else {
    }
    return
  }
  func.func @transform_0(%arg0: i32, %arg1: i32) -> (i32, i32, i32) {
    %c0_i32 = arith.constant 0 : i32
    %c0_i32_0 = arith.constant 0 : i32
    return %arg0, %arg1, %c0_i32 : i32, i32, i32
  }
  func.func @transform_1(%arg0: i32, %arg1: i32) -> (i32, i32) {
    %c0_i32 = arith.constant 0 : i32
    %c0_i32_0 = arith.constant 0 : i32
    %c0_i32_1 = arith.constant 0 : i32
    return %c0_i32, %c0_i32_0 : i32, i32
  }
  func.func @transform_2(%arg0: i32, %arg1: i32) -> (i32, i32) {
    %c0_i32 = arith.constant 0 : i32
    %c0_i32_0 = arith.constant 0 : i32
    %c0_i32_1 = arith.constant 0 : i32
    return %c0_i32, %c0_i32_0 : i32, i32
  }
  func.func @transform_3(%arg0: i32, %arg1: i32) -> (i32, i32) {
    %c0_i32 = arith.constant 0 : i32
    %c0_i32_0 = arith.constant 0 : i32
    return %arg0, %c0_i32 : i32, i32
  }
  func.func @transform_4(%arg0: i32, %arg1: i32) -> (i32, i32) {
    %c0_i32 = arith.constant 0 : i32
    %c0_i32_0 = arith.constant 0 : i32
    return %arg0, %c0_i32 : i32, i32
  }
}

</mosaic_0001>

<bundles_post_ra>
// kernel: tpu_custom_call.1
= control target key start
LH: loop header
LB: loop body
LE: loop exit
PB: predicated region body
PF: predicated region fallthrough
CT: control target
= control target key end

     0   :  { %10 = vsyncpa [#allocation3], 0  ;;  %s378_s0 = inlined_call_operand.hbm [shape: f32[2,8,32], index: 0, kind: input, shape index: {}]   ;;  %s379_s1 = inlined_call_operand.hbm [shape: f32[32,128], index: 1, kind: input, shape index: {}]   ;;  %s380_s2 = inlined_call_operand.vmem [shape: f32[1,128], index: 2, kind: input, shape index: {}]   ;;  %s381_s3 = inlined_call_operand.hbm [shape: f32[2,128], index: 3, kind: output, shape index: {0}]   ;;  %s382_s4 = inlined_call_operand.hbm [shape: f32[2,32], index: 4, kind: output, shape index: {1}]  }
   0x1   :  { %11 = vsyncpa [#allocation6], 0 }
   0x2   :  { %12 = vsyncpa [#allocation4], 0 }
   0x3   :  { %13 = vsyncpa [#allocation9], 0  ;;  %s322_s15 = smov [#allocation2]  }
   0x4   :  { %s19_s16 = sshll.u32 %s322_s15, 4  ;;  %s20_s16 = int_to_ptr.vmem [resolvable:$true] %s19_s16 }
   0x5   :  { %s242_s17 = scalar_lea.vmem %s20_s16, 256  ;;  %p247_p1 = scmp.lt.s32.totalorder %s20_s16, %s20_s16 }
   0x6   :  { %p243_p0 = scmp.ne.s32.totalorder %s20_s16, %s242_s17  ;;  %p248_p2 = scmp.lt.s32.totalorder %s242_s17, %s242_s17 }
   0x8   :  { %p249_p3 = por %p248_p2, %p247_p1 }
   0xa   :  { %p250_p4 = pnand %p249_p3, %p243_p0 }
   0xc   :  { %253 = shalt.err (!%p250_p4)
}
   0xd   :  { %s323_s18 = smov 128   ;;  %s324_s19 = smov 8  }
   0xe   :  { %25 = dma.hbm_to_vmem [thread:$0]  %s378_s0, 256, %s20_s16, [#allocation3], %s323_s18, %s323_s18, %s324_s19  }
   0xf   :  { %s325_s22 = smov [#allocation5]  }
  0x10   :  { %s31_s23 = sshll.u32 %s325_s22, 4  ;;  %s32_s23 = int_to_ptr.vmem [resolvable:$true] %s31_s23 }
  0x11   :  { %s262_s24 = scalar_lea.vmem %s32_s23, 512  ;;  %p267_p6 = scmp.lt.s32.totalorder %s32_s23, %s32_s23 }
  0x12   :  { %p263_p5 = scmp.ne.s32.totalorder %s32_s23, %s262_s24  ;;  %p268_p7 = scmp.lt.s32.totalorder %s262_s24, %s262_s24 }
  0x14   :  { %p269_p8 = por %p268_p7, %p267_p6 }
  0x16   :  { %p270_p9 = pnand %p269_p8, %p263_p5 }
  0x18   :  { %273 = shalt.err (!%p270_p9)
}
  0x19   :  { %37 = dma.hbm_to_vmem [thread:$0]  %s379_s1, 512, %s32_s23, [#allocation6], %s323_s18, %s323_s18, %s324_s19  }
  0x1a   :  { %314 = dma.done.wait [#allocation3], 256  }
  0x1b   :  { %315 = vsyncadd [#allocation3], 4294967040 }
  0x1c   :  { %316 = dma.done.wait [#allocation6], 512  }
  0x1d   :  { %317 = vsyncadd [#allocation6], 4294966784  ;;  %vm50_vm0 = vcmask 254976   ;;  %v326_v0 = vmov 0.0   ;;  %vm327_vm1 = vmmov 0   ;;  %v57_v1 = vld [vmem:[#allocation5 + $0x18] sm:$0xff] }
  0x1e   :  { %215 = vmatprep.subr.mxu0 %v326_v0  ;;  %223 = vmatprep.mubr.msk.f32.mxu0 %vm327_vm1, %v326_v0  ;;  %51 = vst.msk [vmem:[#allocation8] sm:$0x3] %vm50_vm0, %v326_v0  ;;  %v56_v2 = vld [vmem:[#allocation5 + $0x10] sm:$0xff]  ;;  %v55_v3 = vld [vmem:[#allocation5 + $0x8] sm:$0xff]  ;;  %v53_v4 = vld [vmem:[#allocation2 + $0x8] sm:$0x1] }
  0x1f   :  { %216 = vmatpush3.msra.mxu0 %v57_v1  ;;  %vm68_vm2 = vcmask 1041409   ;;  %v52_v5 = vld [vmem:[#allocation2] sm:$0x1]  ;;  %v67_v6 = vrot.slane %v53_v4, 7  ;;  %vm70_vm3 = vcmask 261120   ;;  %v145_v8 = vld [vmem:[#allocation2 + $0x8] sm:$0xff] }
  0x20   :  { %217 = vmatprep.subr.mxu0 %v326_v0  ;;  %v144_v7 = vld [vmem:[#allocation2] sm:$0xff]  ;;  %v154_v10 = vsel %vm70_vm3, %v145_v8, 0.0  ;;  %v54_v11 = vld [vmem:[#allocation5] sm:$0xff]  ;;  %s328_s0 = smov [#allocation8]  }
  0x21   :  { %218 = vmatpush3.msra.mxu0 %v56_v2  ;;  %v147_v9 = vsel %vm70_vm3, %v144_v7, 0.0  ;;  %v155_v13 = vrot.slane %v154_v10, 4  ;;  %v69_v14 = vsel %vm68_vm2, %v67_v6, %v52_v5  ;;  %s194_s1 = sshll.u32 %s328_s0, 4  ;;  %s195_s1 = int_to_ptr.vmem [resolvable:$true] %s194_s1 }
  0x22   :  { %219 = vmatprep.subr.mxu0 %v326_v0  ;;  %v148_v12 = vrot.slane %v147_v9, 4  ;;  %s274_s27 = scalar_lea.vmem %s195_s1, 32  ;;  %p279_p11 = scmp.lt.s32.totalorder %s195_s1, %s195_s1 }
  0x23   :  { %220 = vmatpush3.msra.mxu0 %v55_v3  ;;  %v156_v16 = vadd.f32 %v155_v13, %v154_v10  ;;  %p275_p10 = scmp.ne.s32.totalorder %s195_s1, %s274_s27  ;;  %p280_p12 = scmp.lt.s32.totalorder %s274_s27, %s274_s27 }
  0x24   :  { %221 = vmatprep.subr.mxu0 %v326_v0  ;;  %v149_v15 = vadd.f32 %v148_v12, %v147_v9 }
  0x25   :  { %222 = vmatpush3.msra.mxu0 %v54_v11  ;;  %v157_v18 = vrot.slane %v156_v16, 2  ;;  %v163_v25 = vld [vmem:[#allocation8] sm:$0x3]  ;;  %p281_p13 = por %p280_p12, %p279_p11 }
  0x26   :  { %224 = vmatmul.mubr.msk.f32.vlgmr.msra.gmra.mxu0 %vm70_vm3, %v69_v14  ;;  %v150_v17 = vrot.slane %v149_v15, 2 }
  0x27   :  { %v158_v20 = vadd.f32 %v157_v18, %v156_v16  ;;  %p282_p0 = pnand %p281_p13, %p275_p10 }
  0x28   :  { %v151_v19 = vadd.f32 %v150_v17, %v149_v15 }
  0x29   :  { %v159_v22 = vrot.slane %v158_v20, 1 }
  0x2a   :  { %v152_v21 = vrot.slane %v151_v19, 1 }
  0x2b   :  { %v160_v24 = vadd.f32 %v159_v22, %v158_v20 }
  0x2c   :  { %v153_v23 = vadd.f32 %v152_v21, %v151_v19 }
  0x2e   :  { %v167_v26 = vsel %vm68_vm2, %v160_v24, %v153_v23 }
  0x2f   :  { %v169_v27 = vadd.f32 %v167_v26, %v163_v25 }
  0x31   :  { %171 = vst.msk [vmem:[#allocation8] sm:$0x3] %vm50_vm0, %v169_v27 }
  0x38   :  { %v175_v28 = vld [vmem:[#allocation8] sm:$0x3] }
  0x39   :  { %v176_v29 = vmul.f32 0.125, %v175_v28 }
  0x3b   :  { %177 = vst.msk [vmem:[#allocation8] sm:$0x3] %vm50_vm0, %v176_v29 }
  0x3c   :  { %285 = shalt.err (!%p282_p0)
}
  0x3d   :  { %197 = dma.vmem_to_hbm [thread:$0]  %s195_s1, 32, %s382_s4, [#allocation9]   ;;  %v208_v30 = vld [vmem:[%s380_s2] ss:$0 sm:$0xff] }
  0x3e   :  { %s329_s6 = smov [#allocation7]  }
  0x3f   :  { %s184_s7 = sshll.u32 %s329_s6, 4  ;;  %s185_s7 = int_to_ptr.vmem [resolvable:$true] %s184_s7 }
  0x40   :  { %s294_s8 = scalar_lea.vmem %s185_s7, 32  ;;  %p299_p2 = scmp.lt.s32.totalorder %s185_s7, %s185_s7 }
  0x41   :  { %p295_p1 = scmp.ne.s32.totalorder %s185_s7, %s294_s8  ;;  %p300_p3 = scmp.lt.s32.totalorder %s294_s8, %s294_s8 }
  0x43   :  { %p301_p4 = por %p300_p3, %p299_p2 }
  0x45   :  { %p302_p5 = pnand %p301_p4, %p295_p1 }
  0xe6   :  { %v139_v31 = vpop.f32.mrf.mxu0 }
  0xe7   :  { %v140_v32 = vadd.f32 %v208_v30, %v139_v31 }
  0xe8   :  { %v225_v33 = vpop.f32.mrf.mxu0 }
  0xe9   :  { %143 = vst [vmem:[#allocation7] sm:$0x3] %v140_v32 }
  0xea   :  { %305 = shalt.err (!%p302_p5)
}
  0xeb   :  { %187 = dma.vmem_to_hbm [thread:$0]  %s185_s7, 32, %s381_s3, [#allocation4]  }
  0xec   :  { %318 = dma.done.wait [#allocation4], 32  }
  0xed   :  { %319 = vsyncadd [#allocation4], 4294967264 }
  0xee   :  { %320 = dma.done.wait [#allocation9], 32  }
  0xef   :  { %321 = vsyncadd [#allocation9], 4294967264 }
  0xf0   :  { %204 = vsyncpa [#allocation3], 1 }
  0xf1   :  { %205 = vsyncpa [#allocation6], 1 }
  0xf2   :  { %206 = vsyncpa [#allocation4], 1 }
  0xf3   :  { %207 = vsyncpa [#allocation9], 1 }

</bundles_post_ra>
